<compile_context>
chip_gen: v5e
topology: v5e:2x2
jax: 0.10.0
libtpu: 0.0.40
codegen_flags: <defaults>
</compile_context>

<pallas_src>
import functools
from typing import NamedTuple, Optional

import jax
import jax.numpy as jnp
from jax import lax
from jax.experimental import pallas as pl
from jax.experimental.pallas import tpu as pltpu


class RayBundle(NamedTuple):
    origins: jnp.ndarray                         # [B, 3]
    directions: jnp.ndarray                      # [B, 3]
    sample_points: Optional[jnp.ndarray] = None  # [B, N, 3]
    sample_lengths: Optional[jnp.ndarray] = None # [B, N, 1]


def _raysampler_kernel(o_ref, d_ref, *rest, n_pts, min_depth, max_depth,
                       training):
    """One ray tile.

    o_ref / d_ref : [TB, 3]          (ray origins / directions)
    noise_ref     : [TB, N]          (training only, pre-scaled uniform noise)
    pts_ref       : [3, TB, N]       (channel outermost, N on the lane axis)
    z_ref         : [TB, N]
    """
    if training:
        noise_ref, pts_ref, z_ref = rest
    else:
        pts_ref, z_ref = rest

    tb = o_ref.shape[0]
    # torch.linspace(min, max, N): min + i * (max - min) / (N - 1)
    step = (max_depth - min_depth) / (n_pts - 1) if n_pts > 1 else 0.0
    z = (min_depth
         + lax.broadcasted_iota(jnp.int32, (tb, n_pts), 1).astype(jnp.float32)
         * step)                                          # [TB, N]
    if training:
        z = z + noise_ref[...]
    z_ref[...] = z

    o = o_ref[...]                                        # [TB, 3]
    d = d_ref[...]                                        # [TB, 3]
    # Three lane-dense [TB, N] FMAs; the size-3 channel axis never touches
    # the lane/sublane layout of the wide slabs.
    for c in range(3):
        pts_ref[c] = o[:, c][:, None] + d[:, c][:, None] * z


def _choose_ray_tile(b_pad, n_pts):
    # Size the B-tile so the double-buffered working set (2x pts tile + 2x z
    # tile + noise + inputs) stays well under the default scoped VMEM on every
    # generation, including v7x's 64 MiB physical / 32 MiB scoped budget.
    budget_bytes = 4 * 1024 * 1024            # per pts tile (x2 buffers = 8 MiB)
    tb = budget_bytes // (3 * n_pts * 4)
    tb = max(8, min(2048, (tb // 8) * 8))
    return min(tb, b_pad)


def stratified_raysample(ray_bundle: RayBundle, *, n_pts_per_ray, min_depth,
                         max_depth, training=False, rng_key=None) -> RayBundle:
    origins = ray_bundle.origins.astype(jnp.float32)
    directions = ray_bundle.directions.astype(jnp.float32)
    B = origins.shape[0]
    N = int(n_pts_per_ray)
    min_depth = float(min_depth)
    max_depth = float(max_depth)

    # Pad the ray batch up to a multiple of the tile (tile is a multiple of 8).
    b_pad8 = ((B + 7) // 8) * 8
    TB = _choose_ray_tile(b_pad8, N)
    B_pad = ((B + TB - 1) // TB) * TB
    if B_pad != B:
        pad = ((0, B_pad - B), (0, 0))
        origins_p = jnp.pad(origins, pad)
        directions_p = jnp.pad(directions, pad)
    else:
        origins_p, directions_p = origins, directions

    inputs = [origins_p, directions_p]
    in_specs = [
        pl.BlockSpec((TB, 3), lambda i: (i, 0)),
        pl.BlockSpec((TB, 3), lambda i: (i, 0)),
    ]
    if training:
        # TODO(synk): on hardware this could use in-kernel pltpu.prng_random_bits
        # seeded with (seed + pl.program_id(0)) to avoid one HBM round trip for
        # the noise; drawn host-side here because the TPU PRNG primitives have
        # no CPU/interpret lowering.
        if rng_key is None:
            rng_key = jax.random.PRNGKey(0)
        noise = jax.random.uniform(rng_key, (B_pad, N), dtype=jnp.float32)
        noise = noise * ((max_depth - min_depth) / N)
        inputs.append(noise)
        in_specs.append(pl.BlockSpec((TB, N), lambda i: (i, 0)))

    kernel = functools.partial(
        _raysampler_kernel, n_pts=N, min_depth=min_depth, max_depth=max_depth,
        training=bool(training))

    grid = (B_pad // TB,)
    tile_bytes = 4 * (3 * TB * N + TB * N + 2 * TB * 3
                      + (TB * N if training else 0))
    vmem_limit = int(min(32 * 2**20, max(16 * 2**20, 4 * tile_bytes)))

    flops = 2 * 3 * B_pad * N
    bytes_accessed = 4 * (3 * B_pad * N + B_pad * N + 6 * B_pad
                          + (B_pad * N if training else 0))

    pts_cbn, z = pl.pallas_call(
        kernel,
        grid=grid,
        in_specs=in_specs,
        out_specs=(
            pl.BlockSpec((3, TB, N), lambda i: (0, i, 0)),   # points [3, B, N]
            pl.BlockSpec((TB, N), lambda i: (i, 0)),         # z_vals [B, N]
        ),
        out_shape=(
            jax.ShapeDtypeStruct((3, B_pad, N), jnp.float32),
            jax.ShapeDtypeStruct((B_pad, N), jnp.float32),
        ),
        compiler_params=pltpu.CompilerParams(
            dimension_semantics=("parallel",),
            vmem_limit_bytes=vmem_limit,
        ),
        cost_estimate=pl.CostEstimate(
            flops=flops, transcendentals=0, bytes_accessed=bytes_accessed),
    )(*inputs)

    # PyTorch convention: sample_points [B, N, 3], sample_lengths [B, N, 1].
    # TODO(synk): downstream consumers (positional encoding / MLP) can take the
    # lane-dense [3, B, N] layout directly and skip this transpose.
    sample_points = jnp.transpose(pts_cbn[:, :B, :], (1, 2, 0))
    sample_lengths = z[:B, :, None]
    return ray_bundle._replace(sample_points=sample_points,
                               sample_lengths=sample_lengths)


if __name__ == "__main__":
    key = jax.random.PRNGKey(0)
    k1, k2, k3 = jax.random.split(key, 3)

    B, N = 8, 128                    # small shapes: 8 rays, 128 samples/ray
    MIN_DEPTH, MAX_DEPTH = 2.0, 6.0

    origins = jax.random.normal(k1, (B, 3), dtype=jnp.float32)
    directions = jax.random.normal(k2, (B, 3), dtype=jnp.float32)
    directions = directions / jnp.linalg.norm(directions, axis=-1, keepdims=True)

    rb = RayBundle(origins=origins, directions=directions)

    # Eval-mode forward (deterministic, no stratified noise).
    out = stratified_raysample(rb, n_pts_per_ray=N, min_depth=MIN_DEPTH,
                               max_depth=MAX_DEPTH, training=False)
    jax.block_until_ready(out.sample_points)
    jax.block_until_ready(out.sample_lengths)

    # Pure-JAX reference check.
    z_ref = jnp.linspace(MIN_DEPTH, MAX_DEPTH, N, dtype=jnp.float32)
    pts_ref = origins[:, None, :] + directions[:, None, :] * z_ref[None, :, None]
    assert out.sample_points.shape == (B, N, 3)
    assert out.sample_lengths.shape == (B, N, 1)
    assert jnp.allclose(out.sample_points, pts_ref, atol=1e-5)
    assert jnp.allclose(out.sample_lengths[..., 0],
                        jnp.broadcast_to(z_ref, (B, N)), atol=1e-5)

    # Training-mode path (stratified noise).
    out_tr = stratified_raysample(rb, n_pts_per_ray=N, min_depth=MIN_DEPTH,
                                  max_depth=MAX_DEPTH, training=True,
                                  rng_key=k3)
    jax.block_until_ready(out_tr.sample_points)
    noise = out_tr.sample_lengths[..., 0] - jnp.broadcast_to(z_ref, (B, N))
    assert jnp.all(noise >= -1e-6)
    assert jnp.all(noise <= (MAX_DEPTH - MIN_DEPTH) / N + 1e-5)
    pts_tr_ref = (origins[:, None, :]
                  + directions[:, None, :] * out_tr.sample_lengths)
    assert jnp.allclose(out_tr.sample_points, pts_tr_ref, atol=1e-5)

    print("KERNEL_OK")
</pallas_src>

<mosaic_0001>
module attributes {stable_mosaic.version = 11 : i64} {
  func.func @_raysampler_kernel(%arg0: i32, %arg1: memref<8x3xf32, #tpu.memory_space<vmem>>, %arg2: memref<8x3xf32, #tpu.memory_space<vmem>>, %arg3: memref<3x8x128xf32, #tpu.memory_space<vmem>>, %arg4: memref<8x128xf32, #tpu.memory_space<vmem>>) attributes {dimension_semantics = [#tpu.dimension_semantics<parallel>], iteration_bounds = array<i64: 1>, scalar_prefetch = 0 : i64, scratch_operands = 0 : i64, tpu.core_type = #tpu.core_type<tc>, window_params = [{transform_indices = @transform_0, window_bounds = array<i64: 8, 3>}, {transform_indices = @transform_1, window_bounds = array<i64: 8, 3>}, {transform_indices = @transform_2, window_bounds = array<i64: 3, 8, 128>}, {transform_indices = @transform_3, window_bounds = array<i64: 8, 128>}]} {
    %0 = tpu.iota {dimensions = array<i32: 1>} : vector<8x128xi32>
    %1 = arith.sitofp %0 : vector<8x128xi32> to vector<8x128xf32>
    %cst = arith.constant 0.0314960629 : f32
    %2 = vector.broadcast %cst : f32 to vector<8x128xf32>
    %3 = arith.mulf %1, %2 : vector<8x128xf32>
    %cst_0 = arith.constant 2.000000e+00 : f32
    %4 = vector.broadcast %cst_0 : f32 to vector<8x128xf32>
    %5 = arith.addf %4, %3 : vector<8x128xf32>
    %c0 = arith.constant 0 : index
    %c0_1 = arith.constant 0 : index
    %6 = vector.load %arg4[%c0, %c0_1] : memref<8x128xf32, #tpu.memory_space<vmem>>, vector<8x128xf32>
    tpu.vector_store %arg4[%c0, %c0_1], %5 {strides = array<i32>} : memref<8x128xf32, #tpu.memory_space<vmem>>, vector<8x128xf32>,
    %c0_2 = arith.constant 0 : index
    %c0_3 = arith.constant 0 : index
    %7 = vector.load %arg1[%c0_2, %c0_3] : memref<8x3xf32, #tpu.memory_space<vmem>>, vector<8x3xf32>
    %c0_4 = arith.constant 0 : index
    %c0_5 = arith.constant 0 : index
    %8 = vector.load %arg2[%c0_4, %c0_5] : memref<8x3xf32, #tpu.memory_space<vmem>>, vector<8x3xf32>
    %9 = vector.extract_strided_slice %7 {offsets = [0, 0], sizes = [8, 1], strides = [1, 1]} : vector<8x3xf32> to vector<8x1xf32>
    %10 = vector.shape_cast %9 : vector<8x1xf32> to vector<8xf32>
    %11 = vector.shape_cast %10 : vector<8xf32> to vector<8x1xf32>
    %12 = vector.extract_strided_slice %8 {offsets = [0, 0], sizes = [8, 1], strides = [1, 1]} : vector<8x3xf32> to vector<8x1xf32>
    %13 = vector.shape_cast %12 : vector<8x1xf32> to vector<8xf32>
    %14 = vector.shape_cast %13 : vector<8xf32> to vector<8x1xf32>
    %15 = vector.broadcast %14 : vector<8x1xf32> to vector<8x128xf32>
    %16 = arith.mulf %15, %5 : vector<8x128xf32>
    %17 = vector.broadcast %11 : vector<8x1xf32> to vector<8x128xf32>
    %18 = arith.addf %17, %16 : vector<8x128xf32>
    %c0_6 = arith.constant 0 : index
    %c0_7 = arith.constant 0 : index
    %c0_8 = arith.constant 0 : index
    %19 = vector.load %arg3[%c0_6, %c0_7, %c0_8] : memref<3x8x128xf32, #tpu.memory_space<vmem>>, vector<1x8x128xf32>
    %20 = vector.shape_cast %19 : vector<1x8x128xf32> to vector<8x128xf32>
    %21 = vector.shape_cast %18 : vector<8x128xf32> to vector<1x8x128xf32>
    tpu.vector_store %arg3[%c0_6, %c0_7, %c0_8], %21 {strides = array<i32>} : memref<3x8x128xf32, #tpu.memory_space<vmem>>, vector<1x8x128xf32>,
    %22 = vector.extract_strided_slice %7 {offsets = [0, 1], sizes = [8, 1], strides = [1, 1]} : vector<8x3xf32> to vector<8x1xf32>
    %23 = vector.shape_cast %22 : vector<8x1xf32> to vector<8xf32>
    %24 = vector.shape_cast %23 : vector<8xf32> to vector<8x1xf32>
    %25 = vector.extract_strided_slice %8 {offsets = [0, 1], sizes = [8, 1], strides = [1, 1]} : vector<8x3xf32> to vector<8x1xf32>
    %26 = vector.shape_cast %25 : vector<8x1xf32> to vector<8xf32>
    %27 = vector.shape_cast %26 : vector<8xf32> to vector<8x1xf32>
    %28 = vector.broadcast %27 : vector<8x1xf32> to vector<8x128xf32>
    %29 = arith.mulf %28, %5 : vector<8x128xf32>
    %30 = vector.broadcast %24 : vector<8x1xf32> to vector<8x128xf32>
    %31 = arith.addf %30, %29 : vector<8x128xf32>
    %c1 = arith.constant 1 : index
    %c0_9 = arith.constant 0 : index
    %c0_10 = arith.constant 0 : index
    %32 = vector.load %arg3[%c1, %c0_9, %c0_10] : memref<3x8x128xf32, #tpu.memory_space<vmem>>, vector<1x8x128xf32>
    %33 = vector.shape_cast %32 : vector<1x8x128xf32> to vector<8x128xf32>
    %34 = vector.shape_cast %31 : vector<8x128xf32> to vector<1x8x128xf32>
    tpu.vector_store %arg3[%c1, %c0_9, %c0_10], %34 {strides = array<i32>} : memref<3x8x128xf32, #tpu.memory_space<vmem>>, vector<1x8x128xf32>,
    %35 = vector.extract_strided_slice %7 {offsets = [0, 2], sizes = [8, 1], strides = [1, 1]} : vector<8x3xf32> to vector<8x1xf32>
    %36 = vector.shape_cast %35 : vector<8x1xf32> to vector<8xf32>
    %37 = vector.shape_cast %36 : vector<8xf32> to vector<8x1xf32>
    %38 = vector.extract_strided_slice %8 {offsets = [0, 2], sizes = [8, 1], strides = [1, 1]} : vector<8x3xf32> to vector<8x1xf32>
    %39 = vector.shape_cast %38 : vector<8x1xf32> to vector<8xf32>
    %40 = vector.shape_cast %39 : vector<8xf32> to vector<8x1xf32>
    %41 = vector.broadcast %40 : vector<8x1xf32> to vector<8x128xf32>
    %42 = arith.mulf %41, %5 : vector<8x128xf32>
    %43 = vector.broadcast %37 : vector<8x1xf32> to vector<8x128xf32>
    %44 = arith.addf %43, %42 : vector<8x128xf32>
    %c2 = arith.constant 2 : index
    %c0_11 = arith.constant 0 : index
    %c0_12 = arith.constant 0 : index
    %45 = vector.load %arg3[%c2, %c0_11, %c0_12] : memref<3x8x128xf32, #tpu.memory_space<vmem>>, vector<1x8x128xf32>
    %46 = vector.shape_cast %45 : vector<1x8x128xf32> to vector<8x128xf32>
    %47 = vector.shape_cast %44 : vector<8x128xf32> to vector<1x8x128xf32>
    tpu.vector_store %arg3[%c2, %c0_11, %c0_12], %47 {strides = array<i32>} : memref<3x8x128xf32, #tpu.memory_space<vmem>>, vector<1x8x128xf32>,
    return
  }
  func.func @transform_0(%arg0: i32) -> (i32, i32) {
    %c0_i32 = arith.constant 0 : i32
    %c0_i32_0 = arith.constant 0 : i32
    return %arg0, %c0_i32 : i32, i32
  }
  func.func @transform_1(%arg0: i32) -> (i32, i32) {
    %c0_i32 = arith.constant 0 : i32
    %c0_i32_0 = arith.constant 0 : i32
    return %arg0, %c0_i32 : i32, i32
  }
  func.func @transform_2(%arg0: i32) -> (i32, i32, i32) {
    %c0_i32 = arith.constant 0 : i32
    %c0_i32_0 = arith.constant 0 : i32
    %c0_i32_1 = arith.constant 0 : i32
    return %c0_i32, %arg0, %c0_i32_0 : i32, i32, i32
  }
  func.func @transform_3(%arg0: i32) -> (i32, i32) {
    %c0_i32 = arith.constant 0 : i32
    %c0_i32_0 = arith.constant 0 : i32
    return %arg0, %c0_i32 : i32, i32
  }
}

</mosaic_0001>

<bundles_post_ra>
// kernel: tpu_custom_call.1
= control target key start
LH: loop header
LB: loop body
LE: loop exit
PB: predicated region body
PF: predicated region fallthrough
CT: control target
= control target key end

     0   :  { %9 = vsyncpa [#allocation3], 0  ;;  %v160_v1 = vmov 2   ;;  %v161_v2 = vmov 0   ;;  %s199_s0 = inlined_call_operand.vmem [shape: f32[8,3], index: 0, kind: input, shape index: {}]   ;;  %s200_s1 = inlined_call_operand.vmem [shape: f32[8,3], index: 1, kind: input, shape index: {}]   ;;  %s201_s2 = inlined_call_operand.hbm [shape: f32[3,8,128], index: 2, kind: output, shape index: {0}]   ;;  %s202_s3 = inlined_call_operand.hbm [shape: f32[8,128], index: 3, kind: output, shape index: {1}]  }
   0x1   :  { %v22_v0 = vld [vmem:[%s200_s1] sm:$0xff]  ;;  %103 = vset.pattern.permute.xlu1 %v160_v1  ;;  %101 = vset.pattern.permute.xlu0 %v161_v2 }
   0x2   :  { %10 = vsyncpa [#allocation5], 0  ;;  %49 = vperm.xlu1 %103, %v22_v0   ;;  %25 = vperm.xlu0 %101, %v22_v0   ;;  %v21_v3 = vld [vmem:[%s199_s0] sm:$0xff]  ;;  %v162_v4 = vmov 1   ;;  %v15_v5 = vlaneseq  ;;  %s163_s1 = smov [#allocation4]   ;;  %s80_s19 = sshll.u32 %s202_s3, 4  ;;  %s81_s19 = int_to_ptr.hbm [resolvable:$true] %s80_s19 }
   0x3   :  { %105 = vset.pattern.permute.xlu2 %v162_v4  ;;  %s78_s16 = sshll.u32 %s163_s1, 4  ;;  %s164_s0 = smov [#allocation2]   ;;  %s79_s16 = int_to_ptr.vmem [resolvable:$true] %s78_s16 }
   0x4   :  { %42 = vperm.xlu2 %105, %v21_v3   ;;  %v16_v6 = vand.u32 127, %v15_v5  ;;  %s64_s20 = sshll.u32 %s164_s0, 4  ;;  %s66_s3 = sshll.u32 %s201_s2, 4  ;;  %s65_s20 = int_to_ptr.vmem [resolvable:$true] %s64_s20  ;;  %s67_s3 = int_to_ptr.hbm [resolvable:$true] %s66_s3 }
   0x5   :  { %s165_s23 = smov 128   ;;  %s166_s24 = smov 8  }
   0x6   :  { %v17_v7 = vcvt.s32.f32 %v16_v6 }
   0x8   :  { %v18_v8 = vmul.f32 0.031496063, %v17_v7 }
   0xa   :  { %104 = vset.pattern.permute.xlu1 %v161_v2  ;;  %102 = vset.pattern.permute.xlu0 %v162_v4  ;;  %v19_v9 = vadd.f32 2.0, %v18_v8 }
   0xb   :  { %37 = vperm.xlu0 %102, %v22_v0   ;;  %31 = vperm.xlu1 %104, %v21_v3  }
   0xc   :  { %106 = vset.pattern.permute.xlu2 %v160_v1  ;;  %20 = vst [vmem:[#allocation4] sm:$0xff] %v19_v9 }
   0xd   :  { %54 = vperm.xlu2 %106, %v21_v3   ;;  %83 = dma.vmem_to_hbm [thread:$0]  %s79_s16, 128, %s81_s19, [#allocation5]  }
  0x13   :  { %107 = vset.pattern.permute.xlu0 %v160_v1 }
  0x5e   :  { %v43_v10 = vpop.permute.xlu2 %42 }
  0x67   :  { %v55_v11 = vpop.permute.xlu2 %54 }
  0x74   :  { %v26_v12 = vpop.permute.xlu0 %25  ;;  %v50_v13 = vpop.permute.xlu1 %49 }
  0x75   :  { %v52_v14 = vmul.f32 %v50_v13, %v19_v9  ;;  %v28_v16 = vmul.f32 %v26_v12, %v19_v9 }
  0x77   :  { %v57_v15 = vadd.f32 %v55_v11, %v52_v14 }
  0x79   :  { %59 = vst [vmem:[#allocation2 + $0x10] sm:$0xff] %v57_v15 }
  0x7d   :  { %v38_v17 = vpop.permute.xlu0 %37  ;;  %v32_v18 = vpop.permute.xlu1 %31 }
  0x7e   :  { %v40_v19 = vmul.f32 %v38_v17, %v19_v9  ;;  %v34_v20 = vadd.f32 %v32_v18, %v28_v16 }
  0x80   :  { %v45_v21 = vadd.f32 %v43_v10, %v40_v19  ;;  %35 = vst [vmem:[#allocation2] sm:$0xff] %v34_v20 }
  0x82   :  { %47 = vst [vmem:[#allocation2 + $0x8] sm:$0xff] %v45_v21 }
  0x83   :  { %72 = dma.vmem_to_hbm [thread:$0]  %s65_s20, 384, %s67_s3, [#allocation3], %s165_s23, %s165_s23, %s166_s24  }
  0x84   :  { %156 = dma.done.wait [#allocation3], 384  }
  0x85   :  { %157 = vsyncadd [#allocation3], 4294966912 }
  0x86   :  { %158 = dma.done.wait [#allocation5], 128  }
  0x87   :  { %159 = vsyncadd [#allocation5], 4294967168 }
  0x88   :  { %92 = vsyncpa [#allocation3], 1 }
  0x89   :  { %93 = vsyncpa [#allocation5], 1 }

</bundles_post_ra>
